<compile_context>
chip_gen: v5e
topology: v5e:2x2
jax: 0.10.0
libtpu: 0.0.40
codegen_flags: <defaults>
</compile_context>

<pallas_src>
import functools

import numpy as np

import jax
import jax.numpy as jnp
from jax.experimental import pallas as pl
from jax.experimental.pallas import tpu as pltpu


# ----------------------------------------------------------------------------
# mish(x) = x * tanh(softplus(x)), numerically stable, EUP-friendly.
# ----------------------------------------------------------------------------
def _mish(y):
    sp = jnp.maximum(y, 0.0) + jnp.log(1.0 + jnp.exp(-jnp.abs(y)))
    return y * jnp.tanh(sp)


# ----------------------------------------------------------------------------
# Fused GEMM + bias + mish kernels (used by all 1x1 convs and the im2col
# fallback).  bf16 x bf16 -> f32 accumulate, f32 epilogue, bf16 store.
# ----------------------------------------------------------------------------
def _gemm_bias_mish_kernel(x_ref, w_ref, b_ref, o_ref):
    acc = jnp.dot(x_ref[...], w_ref[...], preferred_element_type=jnp.float32)
    y = acc + b_ref[...]
    o_ref[...] = _mish(y).astype(o_ref.dtype)


def _gemm2_bias_mish_kernel(xl_ref, xr_ref, wl_ref, wr_ref, b_ref, o_ref):
    # Two operands covering disjoint K ranges == fused channel concat.
    acc = jnp.dot(xl_ref[...], wl_ref[...], preferred_element_type=jnp.float32)
    acc = acc + jnp.dot(xr_ref[...], wr_ref[...],
                        preferred_element_type=jnp.float32)
    y = acc + b_ref[...]
    o_ref[...] = _mish(y).astype(o_ref.dtype)


def _pick_tm(m, tm=256):
    # Block second-to-last dim must be /8 or full; 256 is /8, M<tm uses full.
    return tm if m >= tm else m


def _pick_tn(nc, tn=256):
    # Lane dim must be a multiple of 128 or the full extent.
    return min(tn, nc) if nc % 128 == 0 else nc


def gemm_bias_mish(x2d, w2d, bias, *, tm=256, tn=256, out_dtype=jnp.bfloat16):
    """mish(x2d @ w2d + bias) -- no operand padding, ragged blocks via cdiv."""
    m, k = x2d.shape
    k2, nc = w2d.shape
    assert k == k2
    tm = _pick_tm(m, tm)
    tn = _pick_tn(nc, tn)
    b2d = bias.reshape(1, nc).astype(jnp.float32)
    grid = (pl.cdiv(m, tm), pl.cdiv(nc, tn))
    return pl.pallas_call(
        _gemm_bias_mish_kernel,
        out_shape=jax.ShapeDtypeStruct((m, nc), out_dtype),
        grid_spec=pltpu.PrefetchScalarGridSpec(
            num_scalar_prefetch=0,
            grid=grid,
            in_specs=[
                pl.BlockSpec((tm, k), lambda i, j: (i, 0)),
                pl.BlockSpec((k, tn), lambda i, j: (0, j)),
                pl.BlockSpec((1, tn), lambda i, j: (0, j)),
            ],
            out_specs=pl.BlockSpec((tm, tn), lambda i, j: (i, j)),
        ),
        compiler_params=pltpu.CompilerParams(
            dimension_semantics=("parallel", "parallel")),
    )(x2d.astype(jnp.bfloat16), w2d, b2d)


def gemm2_bias_mish(xl, xr, wl, wr, bias, *, tm=256, tn=256,
                    out_dtype=jnp.bfloat16):
    """mish(concat([xl, xr], -1) @ w + bias) with the concat fused away."""
    m, k1 = xl.shape
    m2, k2 = xr.shape
    assert m == m2
    nc = wl.shape[1]
    assert wr.shape == (k2, nc) and wl.shape == (k1, nc)
    tm = _pick_tm(m, tm)
    tn = _pick_tn(nc, tn)
    b2d = bias.reshape(1, nc).astype(jnp.float32)
    grid = (pl.cdiv(m, tm), pl.cdiv(nc, tn))
    return pl.pallas_call(
        _gemm2_bias_mish_kernel,
        out_shape=jax.ShapeDtypeStruct((m, nc), out_dtype),
        grid_spec=pltpu.PrefetchScalarGridSpec(
            num_scalar_prefetch=0,
            grid=grid,
            in_specs=[
                pl.BlockSpec((tm, k1), lambda i, j: (i, 0)),
                pl.BlockSpec((tm, k2), lambda i, j: (i, 0)),
                pl.BlockSpec((k1, tn), lambda i, j: (0, j)),
                pl.BlockSpec((k2, tn), lambda i, j: (0, j)),
                pl.BlockSpec((1, tn), lambda i, j: (0, j)),
            ],
            out_specs=pl.BlockSpec((tm, tn), lambda i, j: (i, j)),
        ),
        compiler_params=pltpu.CompilerParams(
            dimension_semantics=("parallel", "parallel")),
    )(xl.astype(jnp.bfloat16), xr.astype(jnp.bfloat16), wl, wr, b2d)


# ----------------------------------------------------------------------------
# Direct 3x3 conv kernel: padded image block resident in VMEM, 9 taps
# accumulated in-kernel on the MXU (no im2col in HBM).
# ----------------------------------------------------------------------------
def _conv3x3_bias_mish_kernel(x_ref, w_ref, b_ref, o_ref, *, H, W, cin):
    # x_ref: (H+2, W+2, cin) bf16 zero-padded image (one batch element)
    # w_ref: (9, cin, cout)  bf16 folded filter taps
    # b_ref: (1, cout)       f32 folded BN bias
    # o_ref: (H*W, cout)     bf16 output rows (flattened h*W + w)
    acc = None
    for dh in range(3):
        for dw in range(3):
            xs = x_ref[pl.ds(dh, H), pl.ds(dw, W), :]      # (H, W, cin)
            xs = xs.reshape(H * W, cin)                    # W % 8 == 0 required
            part = jnp.dot(xs, w_ref[dh * 3 + dw],
                           preferred_element_type=jnp.float32)
            acc = part if acc is None else acc + part
    y = acc + b_ref[...]
    o_ref[...] = _mish(y).astype(o_ref.dtype)


def conv3x3_bias_mish(x_nhwc, w_taps, bias, *, out_dtype=jnp.bfloat16):
    n, h, w, cin = x_nhwc.shape
    cout = w_taps.shape[-1]
    hp, wp = h + 2, w + 2
    # Single spatial zero-pad (SAME, padding=1); ~1.3x bytes vs the 9x im2col.
    # TODO(synk): fuse the halo read via a manual-DMA row-tiled variant to
    # drop this pad pass and enable H tiling for very large images.
    xp = jnp.pad(x_nhwc.astype(jnp.bfloat16), ((0, 0), (1, 1), (1, 1), (0, 0)))
    b2d = bias.reshape(1, cout).astype(jnp.float32)
    kern = functools.partial(_conv3x3_bias_mish_kernel, H=h, W=w, cin=cin)
    out = pl.pallas_call(
        kern,
        out_shape=jax.ShapeDtypeStruct((n, h * w, cout), out_dtype),
        grid_spec=pltpu.PrefetchScalarGridSpec(
            num_scalar_prefetch=0,
            grid=(n,),
            in_specs=[
                pl.BlockSpec((None, hp, wp, cin), lambda i: (i, 0, 0, 0)),
                pl.BlockSpec((9, cin, cout), lambda i: (0, 0, 0)),
                pl.BlockSpec((1, cout), lambda i: (0, 0)),
            ],
            out_specs=pl.BlockSpec((None, h * w, cout), lambda i: (i, 0, 0)),
        ),
        compiler_params=pltpu.CompilerParams(
            dimension_semantics=("parallel",)),
    )(xp, w_taps, b2d)
    return out.reshape(n, h, w, cout)


# ----------------------------------------------------------------------------
# ConvBNLayer dispatch (conv + folded BN + mish), NHWC bf16 activations.
# ----------------------------------------------------------------------------
def conv_bn_mish(x_nhwc, p):
    n, h, w, cin = x_nhwc.shape
    if p["ksize"] == 1:
        y = gemm_bias_mish(x_nhwc.reshape(n * h * w, cin), p["w_mat"], p["b"])
        return y.reshape(n, h, w, -1)
    # 3x3
    if w % 8 == 0:
        return conv3x3_bias_mish(x_nhwc, p["w_taps"], p["b"])
    # Fallback for awkward widths: im2col + fused GEMM (not hit in the demo).
    xp = jnp.pad(x_nhwc, ((0, 0), (1, 1), (1, 1), (0, 0)))
    patches = [xp[:, dh:dh + h, dw:dw + w, :]
               for dh in range(3) for dw in range(3)]
    xcol = jnp.concatenate(patches, axis=-1).reshape(n * h * w, 9 * cin)
    y = gemm_bias_mish(xcol, p["w_mat"], p["b"])
    return y.reshape(n, h, w, -1)


# ----------------------------------------------------------------------------
# Parameter construction: Conv2d(no bias) + BatchNorm2d(eval) folded together.
# ----------------------------------------------------------------------------
def init_conv_bn(key, cin, cout, ksize, eps=1e-5):
    kw, kg, kb, km, kv = jax.random.split(key, 5)
    fan_in = cin * ksize * ksize
    w = jax.random.normal(kw, (ksize, ksize, cin, cout), jnp.float32) / np.sqrt(fan_in)
    gamma = 1.0 + 0.1 * jax.random.normal(kg, (cout,), jnp.float32)
    beta = 0.1 * jax.random.normal(kb, (cout,), jnp.float32)
    mean = 0.1 * jax.random.normal(km, (cout,), jnp.float32)
    var = jax.random.uniform(kv, (cout,), jnp.float32, minval=0.5, maxval=1.5)
    scale = gamma * jax.lax.rsqrt(var + eps)        # BN eval
    bias = beta - mean * scale
    w_folded = (w * scale).astype(jnp.bfloat16)     # fold BN scale into weights
    p = {
        "ksize": ksize,
        "w_hwio": w_folded,                                     # lax reference
        "w_mat": w_folded.reshape(ksize * ksize * cin, cout),   # GEMM form
        "b": bias,                                              # f32
    }
    if ksize == 3:
        p["w_taps"] = w_folded.reshape(9, cin, cout)            # direct-conv form
    return p


def build_csp_block_params(key, ch_in, ch_out, conv_block_num=2):
    cnt = [0]

    def nk():
        cnt[0] += 1
        return jax.random.fold_in(key, cnt[0])

    params = {
        "conv1": init_conv_bn(nk(), ch_in, ch_out, 1),
        "conv2": init_conv_bn(nk(), ch_in, ch_out, 1),
        "conv3": init_conv_bn(nk(), 2 * ch_out, 2 * ch_out, 1),
        "conv_module": [],
    }
    # cfg == conv_block_num x [ConvBN 1x1, ConvBN 3x3] (the PPYOLO-PAN default).
    # DropBlock is identity in eval mode.
    # TODO(synk): SPP (multi-scale max-pool) conv_module variant not implemented.
    for _ in range(conv_block_num):
        params["conv_module"].append(init_conv_bn(nk(), ch_out, ch_out, 1))
        params["conv_module"].append(init_conv_bn(nk(), ch_out, ch_out, 3))
    return params


# ----------------------------------------------------------------------------
# PPYOLODetBlockCSP forward (NCHW interface, NHWC/bf16 inside).
# ----------------------------------------------------------------------------
def ppyolo_det_block_csp_forward(x_nchw, params):
    x = jnp.transpose(x_nchw, (0, 2, 3, 1)).astype(jnp.bfloat16)   # -> NHWC
    left = conv_bn_mish(x, params["conv1"])
    right = conv_bn_mish(x, params["conv2"])
    for p in params["conv_module"]:
        left = conv_bn_mish(left, p)
    # conv3 over concat([left, right], channels) with the concat fused into
    # the GEMM as two K-ranges.
    n, h, w, cl = left.shape
    cr = right.shape[-1]
    p3 = params["conv3"]
    wl = p3["w_mat"][:cl]
    wr = p3["w_mat"][cl:]
    y = gemm2_bias_mish(left.reshape(n * h * w, cl),
                        right.reshape(n * h * w, cr), wl, wr, p3["b"])
    y = y.reshape(n, h, w, -1)
    y_nchw = jnp.transpose(y, (0, 3, 1, 2))                        # -> NCHW
    return y_nchw, y_nchw


# ----------------------------------------------------------------------------
# Pure-JAX reference (lax conv, same bf16 storage / f32 accumulate numerics).
# ----------------------------------------------------------------------------
def ref_conv_bn_mish(x_nhwc, p):
    y = jax.lax.conv_general_dilated(
        x_nhwc.astype(jnp.bfloat16),
        p["w_hwio"],
        window_strides=(1, 1),
        padding="SAME",
        dimension_numbers=("NHWC", "HWIO", "NHWC"),
        preferred_element_type=jnp.float32,
    )
    y = y + p["b"]
    return _mish(y).astype(jnp.bfloat16)


def ref_forward(x_nchw, params):
    x = jnp.transpose(x_nchw, (0, 2, 3, 1)).astype(jnp.bfloat16)
    left = ref_conv_bn_mish(x, params["conv1"])
    right = ref_conv_bn_mish(x, params["conv2"])
    for p in params["conv_module"]:
        left = ref_conv_bn_mish(left, p)
    cat = jnp.concatenate([left, right], axis=-1)
    y = ref_conv_bn_mish(cat, params["conv3"])
    y_nchw = jnp.transpose(y, (0, 3, 1, 2))
    return y_nchw, y_nchw


# ----------------------------------------------------------------------------
if __name__ == "__main__":
    key = jax.random.PRNGKey(0)

    # Small synthetic config (same structure as the real block, scaled down).
    N, ch_in, ch_out, H, W = 2, 64, 64, 16, 16
    params = build_csp_block_params(jax.random.fold_in(key, 1), ch_in, ch_out,
                                    conv_block_num=2)

    # NCHW input to match the PyTorch interface.
    x = jax.random.normal(jax.random.fold_in(key, 2), (N, ch_in, H, W),
                          jnp.float32)

    out, out2 = ppyolo_det_block_csp_forward(x, params)
    jax.block_until_ready((out, out2))

    ref, _ = ref_forward(x, params)
    jax.block_until_ready(ref)

    assert out.shape == (N, 2 * ch_out, H, W), out.shape
    assert out2.shape == out.shape

    out_f = np.asarray(out.astype(jnp.float32))
    ref_f = np.asarray(ref.astype(jnp.float32))
    np.testing.assert_allclose(out_f, ref_f, rtol=2e-2, atol=2e-2)

    print("KERNEL_OK")
</pallas_src>

<mosaic_0001>
module attributes {stable_mosaic.version = 11 : i64} {
  func.func @_gemm_bias_mish_kernel(%arg0: i32, %arg1: i32, %arg2: memref<256x64xbf16, #tpu.memory_space<vmem>>, %arg3: memref<64x64xbf16, #tpu.memory_space<vmem>>, %arg4: memref<1x64xf32, #tpu.memory_space<vmem>>, %arg5: memref<256x64xbf16, #tpu.memory_space<vmem>>) attributes {dimension_semantics = [#tpu.dimension_semantics<parallel>, #tpu.dimension_semantics<parallel>], iteration_bounds = array<i64: 2, 1>, scalar_prefetch = 0 : i64, scratch_operands = 0 : i64, tpu.core_type = #tpu.core_type<tc>, window_params = [{transform_indices = @transform_0, window_bounds = array<i64: 256, 64>}, {transform_indices = @transform_1, window_bounds = array<i64: 64, 64>}, {transform_indices = @transform_2, window_bounds = array<i64: 1, 64>}, {transform_indices = @transform_3, window_bounds = array<i64: 256, 64>}]} {
    %c0 = arith.constant 0 : index
    %c0_0 = arith.constant 0 : index
    %0 = vector.load %arg2[%c0, %c0_0] : memref<256x64xbf16, #tpu.memory_space<vmem>>, vector<256x64xbf16>
    %c0_1 = arith.constant 0 : index
    %c0_2 = arith.constant 0 : index
    %1 = vector.load %arg3[%c0_1, %c0_2] : memref<64x64xbf16, #tpu.memory_space<vmem>>, vector<64x64xbf16>
    %cst = arith.constant dense<0.000000e+00> : vector<256x64xf32>
    %2 = tpu.matmul %0, %1, %cst {dimension_numbers = #tpu.dot_dimension_numbers<[1], [0], [0], [1], [0, 0, 1, 1], [], []>} : vector<256x64xbf16>, vector<64x64xbf16>, vector<256x64xf32> -> vector<256x64xf32>
    %c0_3 = arith.constant 0 : index
    %c0_4 = arith.constant 0 : index
    %3 = vector.load %arg4[%c0_3, %c0_4] : memref<1x64xf32, #tpu.memory_space<vmem>>, vector<1x64xf32>
    %4 = vector.broadcast %3 : vector<1x64xf32> to vector<256x64xf32>
    %5 = arith.addf %2, %4 : vector<256x64xf32>
    %cst_5 = arith.constant 0.000000e+00 : f32
    %6 = vector.broadcast %cst_5 : f32 to vector<256x64xf32>
    %7 = arith.maximumf %5, %6 : vector<256x64xf32>
    %8 = math.absf %5 : vector<256x64xf32>
    %cst_6 = arith.constant 0.000000e+00 : f32
    %9 = vector.broadcast %cst_6 : f32 to vector<256x64xf32>
    %10 = arith.subf %9, %8 : vector<256x64xf32>
    %11 = math.exp %10 : vector<256x64xf32>
    %cst_7 = arith.constant 1.000000e+00 : f32
    %12 = vector.broadcast %cst_7 : f32 to vector<256x64xf32>
    %13 = arith.addf %12, %11 : vector<256x64xf32>
    %14 = math.log %13 : vector<256x64xf32>
    %15 = arith.addf %7, %14 : vector<256x64xf32>
    %16 = math.tanh %15 : vector<256x64xf32>
    %17 = arith.mulf %5, %16 : vector<256x64xf32>
    %18 = arith.truncf %17 : vector<256x64xf32> to vector<256x64xbf16>
    %c0_8 = arith.constant 0 : index
    %c0_9 = arith.constant 0 : index
    %19 = vector.load %arg5[%c0_8, %c0_9] : memref<256x64xbf16, #tpu.memory_space<vmem>>, vector<256x64xbf16>
    tpu.vector_store %arg5[%c0_8, %c0_9], %18 {strides = array<i32>} : memref<256x64xbf16, #tpu.memory_space<vmem>>, vector<256x64xbf16>,
    return
  }
  func.func @transform_0(%arg0: i32, %arg1: i32) -> (i32, i32) {
    %c0_i32 = arith.constant 0 : i32
    %c0_i32_0 = arith.constant 0 : i32
    return %arg0, %c0_i32 : i32, i32
  }
  func.func @transform_1(%arg0: i32, %arg1: i32) -> (i32, i32) {
    %c0_i32 = arith.constant 0 : i32
    %c0_i32_0 = arith.constant 0 : i32
    return %c0_i32, %arg1 : i32, i32
  }
  func.func @transform_2(%arg0: i32, %arg1: i32) -> (i32, i32) {
    %c0_i32 = arith.constant 0 : i32
    %c0_i32_0 = arith.constant 0 : i32
    return %c0_i32, %arg1 : i32, i32
  }
  func.func @transform_3(%arg0: i32, %arg1: i32) -> (i32, i32) {
    %c0_i32 = arith.constant 0 : i32
    return %arg0, %arg1 : i32, i32
  }
}

</mosaic_0001>

<bundles_post_ra>
// kernel: tpu_custom_call.1
= control target key start
LH: loop header
LB: loop body
LE: loop exit
PB: predicated region body
PF: predicated region fallthrough
CT: control target
= control target key end

     0   :  { %s1433_s12 = smov 0   ;;  %s1435_s13 = smov 0   ;;  %s1788_s0 = inlined_call_operand.vmem [shape: bf16[512,64], index: 0, kind: input, shape index: {}]   ;;  %s1789_s1 = inlined_call_operand.vmem [shape: bf16[64,64], index: 1, kind: input, shape index: {}]   ;;  %s1790_s2 = inlined_call_operand.vmem [shape: f32[1,64], index: 2, kind: input, shape index: {}]   ;;  %s1791_s3 = inlined_call_operand.vmem [shape: bf16[512,64], index: 3, kind: output, shape index: {}]  }
   0x1   :  { %s1437_s14 = smov 0  }
   0x2 LB: > { %s25_s15 = sadd.s32 1, %s1407_s13  ;;  %p1037_p0 = scmp.ge.s32.totalorder %s1411_s14, 1  ;;  %s1411_s14 = sphi %s1437_s14, %s13_s14   ;;  %s1407_s13 = sphi %s1435_s13, %s1793_s13   ;;  %s1403_s12 = sphi %s1433_s12, %s1792_s12  }
   0x3   : > { %p27_p1 = scmp.ge.s32.totalorder %s25_s15, 2  ;;  %p169_p2 = scmp.lt.s32.totalorder %s1411_s14, 3 }
   0x5   : > { %s1795_s15 = smov (%p27_p1, %s25_s15), 0  ;;  %p170_p3 = pnand %p1037_p0, %p169_p2 }
   0x6   : > { %s1038_s18 = sshll.u32 (!%p170_p3), %s1403_s12, 5 }
   0x7   : > { %173 = sbr.rel (%p170_p3) target bundleno = 293 (0x125), region = 32  ;;  %p204_p4 = scmp.lt.s32.totalorder (!%p170_p3), %s1038_s18, 63 }
   0xc   : > { %v1159_v0 = vld [vmem:[%s1789_s1 + $0x18] sm:$0xff]  ;;  %v1158_v1 = vld [vmem:[%s1789_s1 + $0x10] sm:$0xff]  ;;  %s1797_s18 = smov (!%p204_p4, %s1038_s18), 63  ;;  %v1157_v2 = vld [vmem:[%s1789_s1 + $0x8] sm:$0xff]  ;;  %vm374_vm0 = vcmask 523264   ;;  %vm896_vm1 = vcmask 519168  }
   0xd   : > { %427 = vmatpush.bf16.msra.mxu0 %v1159_v0  ;;  %1160 = vmatpush.bf16.msra.mxu1 %v1159_v0  ;;  %s1039_s23 = sshll.u32 %s1797_s18, 2  ;;  %v1156_v3 = vld [vmem:[%s1789_s1] sm:$0xff] }
   0xe   : > { %1161 = vmatpush.bf16.msra.mxu2 %v1159_v0  ;;  %1162 = vmatpush.bf16.msra.mxu3 %v1159_v0  ;;  %s1471_s28 = scalar_lea.vmem %s1788_s0, %s1039_s23  ;;  %v1508_v20 = vld [vmem:[%s1790_s2] ss:$0 sm:$0xff]  ;;  %s1584_s6 = scalar_lea.vmem %s1791_s3, %s1039_s23 }
   0xf   : > { %v1140_v4 = vld [vmem:[%s1471_s28] sm:$0xff]  ;;  %v1141_v8 = vld [vmem:[%s1471_s28 + $0x8] sm:$0xff]  ;;  %v1142_v12 = vld [vmem:[%s1471_s28 + $0x10] sm:$0xff] }
  0x10   : > { %v1144_v5 = vld [vmem:[%s1471_s28 + $0x20] sm:$0xff]  ;;  %v1145_v9 = vld [vmem:[%s1471_s28 + $0x28] sm:$0xff]  ;;  %v1146_v13 = vld [vmem:[%s1471_s28 + $0x30] sm:$0xff] }
  0x11   : > { %428 = vmatpush.bf16.msra.mxu0 %v1158_v1  ;;  %1163 = vmatpush.bf16.msra.mxu1 %v1158_v1  ;;  %v1148_v6 = vld [vmem:[%s1471_s28 + $0x40] sm:$0xff]  ;;  %v1149_v10 = vld [vmem:[%s1471_s28 + $0x48] sm:$0xff]  ;;  %v1150_v14 = vld [vmem:[%s1471_s28 + $0x50] sm:$0xff] }
  0x12   : > { %1164 = vmatpush.bf16.msra.mxu2 %v1158_v1  ;;  %1165 = vmatpush.bf16.msra.mxu3 %v1158_v1  ;;  %v1152_v7 = vld [vmem:[%s1471_s28 + $0x60] sm:$0xff]  ;;  %v1153_v11 = vld [vmem:[%s1471_s28 + $0x68] sm:$0xff]  ;;  %v1154_v15 = vld [vmem:[%s1471_s28 + $0x70] sm:$0xff] }
  0x13   : > { %v1143_v16 = vld [vmem:[%s1471_s28 + $0x18] sm:$0xff] }
  0x14   : > { %v1147_v17 = vld [vmem:[%s1471_s28 + $0x38] sm:$0xff] }
  0x15   : > { %429 = vmatpush.bf16.msra.mxu0 %v1157_v2  ;;  %1166 = vmatpush.bf16.msra.mxu1 %v1157_v2  ;;  %v1151_v18 = vld [vmem:[%s1471_s28 + $0x58] sm:$0xff] }
  0x16   : > { %1167 = vmatpush.bf16.msra.mxu2 %v1157_v2  ;;  %1168 = vmatpush.bf16.msra.mxu3 %v1157_v2  ;;  %v1155_v19 = vld [vmem:[%s1471_s28 + $0x78] sm:$0xff] }
  0x19   : > { %430 = vmatpush.bf16.msra.mxu0 %v1156_v3  ;;  %1169 = vmatpush.bf16.msra.mxu1 %v1156_v3 }
  0x1a   : > { %1170 = vmatpush.bf16.msra.mxu2 %v1156_v3  ;;  %1171 = vmatpush.bf16.msra.mxu3 %v1156_v3 }
  0x1c   : > { %1122 = vmatmul.msk.bf16.vlgmr.msra.gmra.mxu0 %vm374_vm0, %v1140_v4  ;;  %1126 = vmatmul.msk.bf16.vlgmr.msra.gmra.mxu1 %vm374_vm0, %v1144_v5 }
  0x1d   : > { %1130 = vmatmul.msk.bf16.vlgmr.msra.gmra.mxu2 %vm374_vm0, %v1148_v6  ;;  %1134 = vmatmul.msk.bf16.vlgmr.msra.gmra.mxu3 %vm374_vm0, %v1152_v7 }
  0x2c   : > { %1123 = vmatmul.msk.bf16.gmra.mxu0 %vm374_vm0, %v1141_v8  ;;  %1127 = vmatmul.msk.bf16.gmra.mxu1 %vm374_vm0, %v1145_v9 }
  0x2d   : > { %1131 = vmatmul.msk.bf16.gmra.mxu2 %vm374_vm0, %v1149_v10  ;;  %1135 = vmatmul.msk.bf16.gmra.mxu3 %vm374_vm0, %v1153_v11 }
  0x3c   : > { %1124 = vmatmul.msk.bf16.gmra.mxu0 %vm374_vm0, %v1142_v12  ;;  %1128 = vmatmul.msk.bf16.gmra.mxu1 %vm374_vm0, %v1146_v13 }
  0x3d   : > { %1132 = vmatmul.msk.bf16.gmra.mxu2 %vm374_vm0, %v1150_v14  ;;  %1136 = vmatmul.msk.bf16.gmra.mxu3 %vm374_vm0, %v1154_v15 }
  0x4c   : > { %1125 = vmatmul.msk.bf16.gmra.mxu0 %vm374_vm0, %v1143_v16  ;;  %1129 = vmatmul.msk.bf16.gmra.mxu1 %vm374_vm0, %v1147_v17 }
  0x4d   : > { %1133 = vmatmul.msk.bf16.gmra.mxu2 %vm374_vm0, %v1151_v18  ;;  %1137 = vmatmul.msk.bf16.gmra.mxu3 %vm374_vm0, %v1155_v19 }
  0x99   : > { %v432_v21 = vpop.f32.mrf.mxu0  ;;  %v452_v22 = vpop.f32.mrf.mxu1 }
  0x9a   : > { %v1511_v23 = vadd.f32 %v1508_v20, %v432_v21  ;;  %v1514_v24 = vadd.f32 %v1508_v20, %v452_v22 }
  0x9c   : > { %v544_v25 = vand.u32 2147483647, %v1511_v23  ;;  %v552_v26 = vand.u32 2147483647, %v1514_v24  ;;  %v512_v9 = vmax.f32 %v1511_v23, 0.0  ;;  %v520_v10 = vmax.f32 %v1514_v24, 0.0 }
  0x9e   : > { %v576_v27 = vsub.f32 0.0, %v544_v25  ;;  %v584_v28 = vsub.f32 0.0, %v552_v26 }
  0xa0   : > { %v608_v29 = vmul.f32 1.442695, %v576_v27  ;;  %v624_v30 = vmul.f32 1.442695, %v584_v28  ;;  %v472_v31 = vpop.f32.mrf.mxu2  ;;  %v492_v32 = vpop.f32.mrf.mxu3 }
  0xa1   : > { %v1519_v33 = vadd.f32 %v1508_v20, %v472_v31  ;;  %v1522_v34 = vadd.f32 %v1508_v20, %v492_v32  ;;  %v434_v35 = vpop.f32.mrf.mxu0  ;;  %v454_v36 = vpop.f32.mrf.mxu1 }
  0xa2   : > { %1197 = vpow2.f32 %v608_v29  ;;  %v1525_v37 = vadd.f32 %v1508_v20, %v434_v35  ;;  %v1528_v38 = vadd.f32 %v1508_v20, %v454_v36 }
  0xa3   : > { %1199 = vpow2.f32 %v624_v30  ;;  %v560_v39 = vand.u32 2147483647, %v1519_v33  ;;  %v568_v40 = vand.u32 2147483647, %v1522_v34  ;;  %v528_v22 = vmax.f32 %v1519_v33, 0.0 }
  0xa4   : > { %v545_v41 = vand.u32 2147483647, %v1525_v37  ;;  %v553_v43 = vand.u32 2147483647, %v1528_v38  ;;  %v536_v36 = vmax.f32 %v1522_v34, 0.0 }
  0xa5   : > { %v592_v42 = vsub.f32 0.0, %v560_v39  ;;  %v600_v44 = vsub.f32 0.0, %v568_v40 }
  0xa6   : > { %v577_v45 = vsub.f32 0.0, %v545_v41  ;;  %v585_v47 = vsub.f32 0.0, %v553_v43 }
  0xa7   : > { %v640_v46 = vmul.f32 1.442695, %v592_v42  ;;  %v656_v49 = vmul.f32 1.442695, %v600_v44 }
  0xa8   : > { %v1198_v48 = vpop.eup %1197  ;;  %v610_v50 = vmul.f32 1.442695, %v577_v45  ;;  %v474_v51 = vpop.f32.mrf.mxu2  ;;  %v626_v55 = vmul.f32 1.442695, %v585_v47  ;;  %v513_v47 = vmax.f32 %v1525_v37, 0.0 }
  0xa9   : > { %v494_v52 = vpop.f32.mrf.mxu3  ;;  %v1200_v53 = vpop.eup %1199  ;;  %v672_v54 = vadd.f32 1.0, %v1198_v48  ;;  %1201 = vpow2.f32 %v640_v46  ;;  %v1535_v56 = vadd.f32 %v1508_v20, %v474_v51  ;;  %v521_v48 = vmax.f32 %v1528_v38, 0.0 }
  0xaa   : > { %v437_v57 = vpop.f32.mrf.mxu0  ;;  %v457_v58 = vpop.f32.mrf.mxu1  ;;  %v680_v59 = vadd.f32 1.0, %v1200_v53  ;;  %1203 = vpow2.f32 %v656_v49  ;;  %v1538_v60 = vadd.f32 %v1508_v20, %v494_v52 }
  0xab   : > { %v1541_v61 = vadd.f32 %v1508_v20, %v437_v57  ;;  %1205 = vlog2.f32 %v672_v54  ;;  %v561_v62 = vand.u32 2147483647, %v1535_v56  ;;  %v1545_v63 = vadd.f32 %v1508_v20, %v457_v58 }
  0xac   : > { %1207 = vlog2.f32 %v680_v59  ;;  %v569_v0 = vand.u32 2147483647, %v1538_v60  ;;  %v529_v51 = vmax.f32 %v1535_v56, 0.0 }
  0xad   : > { %1209 = vpow2.f32 %v610_v50  ;;  %v593_v1 = vsub.f32 0.0, %v561_v62  ;;  %v546_v2 = vand.u32 2147483647, %v1541_v61  ;;  %v554_v7 = vand.u32 2147483647, %v1545_v63 }
  0xae   : > { %1211 = vpow2.f32 %v626_v55  ;;  %v601_v3 = vsub.f32 0.0, %v569_v0  ;;  %v537_v0 = vmax.f32 %v1538_v60, 0.0 }
  0xaf   : > { %v1202_v4 = vpop.eup %1201  ;;  %v642_v5 = vmul.f32 1.442695, %v593_v1  ;;  %v578_v6 = vsub.f32 0.0, %v546_v2  ;;  %v586_v28 = vsub.f32 0.0, %v554_v7 }
  0xb0   : > { %v1204_v8 = vpop.eup %1203  ;;  %v688_v11 = vadd.f32 1.0, %v1202_v4  ;;  %v658_v12 = vmul.f32 1.442695, %v601_v3  ;;  %v477_v13 = vpop.f32.mrf.mxu2 }
  0xb1   : > { %v497_v14 = vpop.f32.mrf.mxu3  ;;  %v1206_v15 = vpop.eup %1205  ;;  %v696_v16 = vadd.f32 1.0, %v1204_v8  ;;  %1213 = vpow2.f32 %v642_v5  ;;  %v612_v17 = vmul.f32 1.442695, %v578_v6  ;;  %v1553_v18 = vadd.f32 %v1508_v20, %v477_v13 }
  0xb2   : > { %v1208_v19 = vpop.eup %1207  ;;  %v705_v21 = vmul.f32 0.6931472, %v1206_v15  ;;  %1215 = vlog2.f32 %v688_v11  ;;  %v1557_v25 = vadd.f32 %v1508_v20, %v497_v14  ;;  %v439_v30 = vpop.f32.mrf.mxu0  ;;  %v628_v49 = vmul.f32 1.442695, %v586_v28 }
  0xb3   : > { %v1210_v26 = vpop.eup %1209  ;;  %v721_v27 = vmul.f32 0.6931472, %v1208_v19  ;;  %1217 = vlog2.f32 %v696_v16  ;;  %v562_v29 = vand.u32 2147483647, %v1553_v18  ;;  %v459_v31 = vpop.f32.mrf.mxu1  ;;  %v1563_v44 = vadd.f32 %v1508_v20, %v439_v30 }
  0xb4   : > { %v1212_v32 = vpop.eup %1211  ;;  %v768_v35 = vadd.f32 %v705_v21, %v512_v9  ;;  %v673_v39 = vadd.f32 1.0, %v1210_v26  ;;  %1219 = vpow2.f32 %v658_v12  ;;  %v570_v43 = vand.u32 2147483647, %v1557_v25 }
  0xb5   : > { %v776_v40 = vadd.f32 %v721_v27, %v520_v10  ;;  %v681_v41 = vadd.f32 1.0, %v1212_v32  ;;  %1221 = vpow2.f32 %v612_v17  ;;  %v594_v42 = vsub.f32 0.0, %v562_v29 }
  0xb6   : > { %1223 = vtanh.f32 %v768_v35  ;;  %v1566_v45 = vadd.f32 %v1508_v20, %v459_v31  ;;  %v602_v57 = vsub.f32 0.0, %v570_v43  ;;  %v547_v58 = vand.u32 2147483647, %v1563_v44 }
  0xb7   : > { %v1214_v46 = vpop.eup %1213  ;;  %1225 = vtanh.f32 %v776_v40  ;;  %v644_v53 = vmul.f32 1.442695, %v594_v42  ;;  %v514_v9 = vmax.f32 %v1541_v61, 0.0 }
  0xb8   : > { %v1216_v50 = vpop.eup %1215  ;;  %1227 = vlog2.f32 %v673_v39  ;;  %v689_v52 = vadd.f32 1.0, %v1214_v46  ;;  %v555_v1 = vand.u32 2147483647, %v1566_v45  ;;  %v479_v2 = vpop.f32.mrf.mxu2  ;;  %v579_v6 = vsub.f32 0.0, %v547_v58 }
  0xb9   : > { %v1218_v54 = vpop.eup %1217  ;;  %v737_v55 = vmul.f32 0.6931472, %v1216_v50  ;;  %1229 = vlog2.f32 %v681_v41  ;;  %v499_v11 = vpop.f32.mrf.mxu3  ;;  %v660_v14 = vmul.f32 1.442695, %v602_v57  ;;  %v1577_v15 = vadd.f32 %v1508_v20, %v479_v2 }
  0xba   : > { %v1220_v59 = vpop.eup %1219  ;;  %v753_v62 = vmul.f32 0.6931472, %v1218_v54  ;;  %1231 = vlog2.f32 %v689_v52  ;;  %v614_v19 = vmul.f32 1.442695, %v579_v6  ;;  %v587_v21 = vsub.f32 0.0, %v555_v1  ;;  %v442_v39 = vpop.f32.mrf.mxu0 }
  0xbb   : > { %v1222_v3 = vpop.eup %1221  ;;  %v784_v4 = vadd.f32 %v737_v55, %v528_v22  ;;  %v697_v5 = vadd.f32 1.0, %v1220_v59  ;;  %1233 = vpow2.f32 %v628_v49  ;;  %v1588_v27 = vadd.f32 %v1508_v20, %v499_v11 }
  0xbc   : > { %v1224_v7 = vpop.eup %1223  ;;  %v792_v8 = vadd.f32 %v753_v62, %v536_v36  ;;  %v674_v10 = vadd.f32 1.0, %v1222_v3  ;;  %1235 = vpow2.f32 %v644_v53  ;;  %v563_v31 = vand.u32 2147483647, %v1577_v15  ;;  %v462_v53 = vpop.f32.mrf.mxu1 }
  0xbd   : > { %v1226_v12 = vpop.eup %1225  ;;  %v832_v13 = vmul.f32 %v1224_v7, %v1511_v23  ;;  %1237 = vtanh.f32 %v784_v4  ;;  %v522_v36 = vmax.f32 %v1545_v63, 0.0  ;;  %v571_v52 = vand.u32 2147483647, %v1588_v27 }
  0xbe   : > { %v1228_v16 = vpop.eup %1227  ;;  %v840_v17 = vmul.f32 %v1226_v12, %v1514_v24  ;;  %1239 = vtanh.f32 %v792_v8  ;;  %v595_v43 = vsub.f32 0.0, %v563_v31  ;;  %v630_v55 = vmul.f32 1.442695, %v587_v21 }
  0xbf   : > { %v1230_v22 = vpop.eup %1229  ;;  %v864_v23 = vpack.c.bf16 %v832_v13, %v832_v13  ;;  %v707_v26 = vmul.f32 0.6931472, %v1228_v16  ;;  %1241 = vlog2.f32 %v697_v5  ;;  %v1599_v57 = vadd.f32 %v1508_v20, %v442_v39 }
  0xc0   : > { %v1232_v28 = vpop.eup %1231  ;;  %v872_v29 = vpack.c.bf16 %v840_v17, %v840_v17  ;;  %v723_v30 = vmul.f32 0.6931472, %v1230_v22  ;;  %1243 = vlog2.f32 %v674_v10  ;;  %v646_v59 = vmul.f32 1.442695, %v595_v43  ;;  %v482_v11 = vpop.f32.mrf.mxu2 }
  0xc1   : > { %v1234_v32 = vpop.eup %1233  ;;  %897 = vst.msk [vmem:[%s1584_s6] sm:$0xf] %vm896_vm1, %v864_v23  ;;  %v769_v24 = vadd.f32 %v707_v26, %v513_v47  ;;  %v739_v35 = vmul.f32 0.6931472, %v1232_v28  ;;  %1245 = vpow2.f32 %v660_v14  ;;  %v603_v62 = vsub.f32 0.0, %v571_v52  ;;  %v502_v12 = vpop.f32.mrf.mxu3 }
  0xc2   : > { %v1236_v40 = vpop.eup %1235  ;;  %905 = vst.msk [vmem:[%s1584_s6 + $0x20] sm:$0xf] %vm896_vm1, %v872_v29  ;;  %v777_v41 = vadd.f32 %v723_v30, %v521_v48  ;;  %v682_v42 = vadd.f32 1.0, %v1234_v32  ;;  %1247 = vpow2.f32 %v614_v19  ;;  %v1603_v3 = vadd.f32 %v1508_v20, %v462_v53  ;;  %v444_v43 = vpop.f32.mrf.mxu0 }
  0xc3   : > { %v1238_v46 = vpop.eup %1237  ;;  %1249 = vtanh.f32 %v769_v24  ;;  %v785_v49 = vadd.f32 %v739_v35, %v529_v51  ;;  %v690_v50 = vadd.f32 1.0, %v1236_v40  ;;  %v530_v6 = vmax.f32 %v1553_v18, 0.0 }
  0xc4   : > { %v1240_v47 = vpop.eup %1239  ;;  %v848_v54 = vmul.f32 %v1238_v46, %v1519_v33  ;;  %1251 = vtanh.f32 %v777_v41  ;;  %v548_v10 = vand.u32 2147483647, %v1599_v57  ;;  %v662_v17 = vmul.f32 1.442695, %v603_v62  ;;  %v464_v52 = vpop.f32.mrf.mxu1 }
  0xc5   : > { %v1242_v58 = vpop.eup %1241  ;;  %v856_v48 = vmul.f32 %v1240_v47, %v1522_v34  ;;  %1253 = vtanh.f32 %v785_v49  ;;  %v556_v22 = vand.u32 2147483647, %v1603_v3  ;;  %v1619_v28 = vadd.f32 %v1508_v20, %v482_v11 }
  0xc6   : > { %v1244_v51 = vpop.eup %1243  ;;  %v880_v1 = vpack.c.bf16 %v848_v54, %v848_v54  ;;  %v755_v2 = vmul.f32 0.6931472, %v1242_v58  ;;  %1255 = vlog2.f32 %v682_v42  ;;  %v538_v42 = vmax.f32 %v1557_v25, 0.0 }
  0xc7   : > { %v1246_v33 = vpop.eup %1245  ;;  %v888_v4 = vpack.c.bf16 %v856_v48, %v856_v48  ;;  %v709_v5 = vmul.f32 0.6931472, %v1244_v51  ;;  %1257 = vlog2.f32 %v690_v50  ;;  %v588_v39 = vsub.f32 0.0, %v556_v22 }
  0xc8   : > { %v1248_v7 = vpop.eup %1247  ;;  %913 = vst.msk [vmem:[%s1584_s6 + $0x40] sm:$0xf] %vm896_vm1, %v880_v1  ;;  %v793_v34 = vadd.f32 %v755_v2, %v537_v0  ;;  %v698_v8 = vadd.f32 1.0, %v1246_v33  ;;  %1259 = vpow2.f32 %v630_v55  ;;  %v580_v0 = vsub.f32 0.0, %v548_v10 }
  0xc9   : > { %v1250_v13 = vpop.eup %1249  ;;  %921 = vst.msk [vmem:[%s1584_s6 + $0x60] sm:$0xf] %vm896_vm1, %v888_v4  ;;  %v770_v14 = vadd.f32 %v709_v5, %v514_v9  ;;  %v675_v16 = vadd.f32 1.0, %v1248_v7  ;;  %1261 = vpow2.f32 %v646_v59  ;;  %v1622_v9 = vadd.f32 %v1508_v20, %v502_v12 }
  0xca   : > { %v1252_v19 = vpop.eup %1251  ;;  %v833_v21 = vmul.f32 %v1250_v13, %v1525_v37  ;;  %1263 = vtanh.f32 %v793_v34  ;;  %v616_v37 = vmul.f32 1.442695, %v580_v0  ;;  %v632_v50 = vmul.f32 1.442695, %v588_v39 }
  0xcb   : > { %v1254_v23 = vpop.eup %1253  ;;  %v841_v26 = vmul.f32 %v1252_v19, %v1528_v38  ;;  %1265 = vtanh.f32 %v770_v14  ;;  %v515_v54 = vmax.f32 %v1563_v44, 0.0  ;;  %v564_v58 = vand.u32 2147483647, %v1619_v28  ;;  %v484_v14 = vpop.f32.mrf.mxu2 }
  0xcc   : > { %v1256_v29 = vpop.eup %1255  ;;  %v865_v30 = vpack.c.bf16 %v833_v21, %v833_v21  ;;  %v849_v31 = vmul.f32 %v1254_v23, %v1535_v56  ;;  %1267 = vlog2.f32 %v698_v8  ;;  %v572_v62 = vand.u32 2147483647, %v1622_v9 }
  0xcd   : > { %v1258_v32 = vpop.eup %1257  ;;  %v873_v24 = vpack.c.bf16 %v841_v26, %v841_v26  ;;  %v725_v35 = vmul.f32 0.6931472, %v1256_v29  ;;  %1269 = vlog2.f32 %v675_v16  ;;  %v596_v2 = vsub.f32 0.0, %v564_v58  ;;  %v504_v26 = vpop.f32.mrf.mxu3 }
  0xce   : > { %v1260_v38 = vpop.eup %1259  ;;  %898 = vst.msk [vmem:[%s1584_s6 + $0x4] sm:$0xf] %vm896_vm1, %v865_v30  ;;  %v881_v40 = vpack.c.bf16 %v849_v31, %v849_v31  ;;  %v741_v41 = vmul.f32 0.6931472, %v1258_v32  ;;  %1271 = vpow2.f32 %v662_v17  ;;  %v1643_v33 = vadd.f32 %v1508_v20, %v464_v52 }
  0xcf   : > { %v1262_v46 = vpop.eup %1261  ;;  %906 = vst.msk [vmem:[%s1584_s6 + $0x24] sm:$0xf] %vm896_vm1, %v873_v24  ;;  %v778_v56 = vadd.f32 %v725_v35, %v522_v36  ;;  %v683_v49 = vadd.f32 1.0, %v1260_v38  ;;  %1273 = vpow2.f32 %v616_v37  ;;  %v1639_v36 = vadd.f32 %v1508_v20, %v444_v43 }
  0xd0   : > { %v1264_v53 = vpop.eup %1263  ;;  %914 = vst.msk [vmem:[%s1584_s6 + $0x44] sm:$0xf] %vm896_vm1, %v881_v40  ;;  %v786_v47 = vadd.f32 %v741_v41, %v530_v6  ;;  %v691_v55 = vadd.f32 1.0, %v1262_v46  ;;  %v648_v10 = vmul.f32 1.442695, %v596_v2  ;;  %v523_v12 = vmax.f32 %v1566_v45, 0.0 }
  0xd1   : > { %v1266_v48 = vpop.eup %1265  ;;  %v857_v59 = vmul.f32 %v1264_v53, %v1538_v60  ;;  %1275 = vtanh.f32 %v778_v56  ;;  %v604_v60 = vsub.f32 0.0, %v572_v62  ;;  %v531_v17 = vmax.f32 %v1577_v15, 0.0 }
  0xd2   : > { %v1268_v51 = vpop.eup %1267  ;;  %v834_v1 = vmul.f32 %v1266_v48, %v1541_v61  ;;  %1277 = vtanh.f32 %v786_v47  ;;  %v549_v22 = vand.u32 2147483647, %v1639_v36  ;;  %v557_v23 = vand.u32 2147483647, %v1643_v33 }
  0xd3   : > { %v1270_v4 = vpop.eup %1269  ;;  %v889_v5 = vpack.c.bf16 %v857_v59, %v857_v59  ;;  %v757_v6 = vmul.f32 0.6931472, %v1268_v51  ;;  %1279 = vlog2.f32 %v683_v49  ;;  %v664_v0 = vmul.f32 1.442695, %v604_v60  ;;  %v447_v49 = vpop.f32.mrf.mxu0 }
  0xd4   : > { %v1272_v7 = vpop.eup %1271  ;;  %v866_v34 = vpack.c.bf16 %v834_v1, %v834_v1  ;;  %v711_v8 = vmul.f32 0.6931472, %v1270_v4  ;;  %1281 = vlog2.f32 %v691_v55  ;;  %v539_v31 = vmax.f32 %v1588_v27, 0.0 }
  0xd5   : > { %v1274_v11 = vpop.eup %1273  ;;  %922 = vst.msk [vmem:[%s1584_s6 + $0x64] sm:$0xf] %vm896_vm1, %v889_v5  ;;  %v794_v61 = vadd.f32 %v757_v6, %v538_v42  ;;  %v699_v13 = vadd.f32 1.0, %v1272_v7  ;;  %1283 = vpow2.f32 %v632_v50  ;;  %v1656_v37 = vadd.f32 %v1508_v20, %v484_v14 }
  0xd6   : > { %899 = vst.msk [vmem:[%s1584_s6 + $0x8] sm:$0xf] %vm896_vm1, %v866_v34  ;;  %v771_v16 = vadd.f32 %v711_v8, %v515_v54  ;;  %v676_v19 = vadd.f32 1.0, %v1274_v11  ;;  %1285 = vpow2.f32 %v648_v10  ;;  %v581_v35 = vsub.f32 0.0, %v549_v22  ;;  %v467_v54 = vpop.f32.mrf.mxu1  ;;  %v507_v22 = vpop.f32.mrf.mxu3 }
  0xd7   : > { %v1276_v21 = vpop.eup %1275  ;;  %1287 = vtanh.f32 %v794_v61  ;;  %v589_v39 = vsub.f32 0.0, %v557_v23  ;;  %v516_v52 = vmax.f32 %v1599_v57, 0.0  ;;  %v565_v59 = vand.u32 2147483647, %v1656_v37 }
  0xd8   : > { %v1278_v29 = vpop.eup %1277  ;;  %v842_v30 = vmul.f32 %v1276_v21, %v1545_v63  ;;  %1289 = vtanh.f32 %v771_v16  ;;  %v1660_v63 = vadd.f32 %v1508_v20, %v504_v26  ;;  %v618_v56 = vmul.f32 1.442695, %v581_v35  ;;  %v487_v16 = vpop.f32.mrf.mxu2 }
  0xd9   : > { %v1280_v32 = vpop.eup %1279  ;;  %v850_v24 = vmul.f32 %v1278_v29, %v1553_v18  ;;  %1291 = vlog2.f32 %v699_v13  ;;  %v634_v47 = vmul.f32 1.442695, %v589_v39  ;;  %v1671_v2 = vadd.f32 %v1508_v20, %v447_v49 }
  0xda   : > { %v1282_v38 = vpop.eup %1281  ;;  %v874_v40 = vpack.c.bf16 %v842_v30, %v842_v30  ;;  %v727_v41 = vmul.f32 0.6931472, %v1280_v32  ;;  %1293 = vlog2.f32 %v676_v19  ;;  %v573_v1 = vand.u32 2147483647, %v1660_v63 }
  0xdb   : > { %v1284_v42 = vpop.eup %1283  ;;  %v882_v43 = vpack.c.bf16 %v850_v24, %v850_v24  ;;  %v743_v46 = vmul.f32 0.6931472, %v1282_v38  ;;  %1295 = vpow2.f32 %v664_v0  ;;  %v597_v6 = vsub.f32 0.0, %v565_v59 }
  0xdc   : > { %v1286_v50 = vpop.eup %1285  ;;  %907 = vst.msk [vmem:[%s1584_s6 + $0x28] sm:$0xf] %vm896_vm1, %v874_v40  ;;  %v779_v18 = vadd.f32 %v727_v41, %v523_v12  ;;  %v684_v53 = vadd.f32 1.0, %v1284_v42  ;;  %1297 = vpow2.f32 %v618_v56  ;;  %v1675_v60 = vadd.f32 %v1508_v20, %v467_v54  ;;  %v449_v54 = vpop.f32.mrf.mxu0 }
  0xdd   : > { %v1288_v55 = vpop.eup %1287  ;;  %915 = vst.msk [vmem:[%s1584_s6 + $0x48] sm:$0xf] %vm896_vm1, %v882_v43  ;;  %v787_v58 = vadd.f32 %v743_v46, %v531_v17  ;;  %v692_v48 = vadd.f32 1.0, %v1286_v50  ;;  %v650_v12 = vmul.f32 1.442695, %v597_v6  ;;  %v532_v21 = vmax.f32 %v1619_v28, 0.0 }
  0xde   : > { %v1290_v62 = vpop.eup %1289  ;;  %v858_v51 = vmul.f32 %v1288_v55, %v1557_v25  ;;  %1299 = vtanh.f32 %v779_v18  ;;  %v605_v25 = vsub.f32 0.0, %v573_v1  ;;  %v550_v0 = vand.u32 2147483647, %v1671_v2 }
  0xdf   : > { %v1292_v4 = vpop.eup %1291  ;;  %v835_v5 = vmul.f32 %v1290_v62, %v1563_v44  ;;  %1301 = vtanh.f32 %v787_v58  ;;  %v524_v44 = vmax.f32 %v1603_v3, 0.0  ;;  %v558_v30 = vand.u32 2147483647, %v1675_v60 }
  0xe0   : > { %v1294_v7 = vpop.eup %1293  ;;  %v890_v34 = vpack.c.bf16 %v858_v51, %v858_v51  ;;  %v759_v8 = vmul.f32 0.6931472, %v1292_v4  ;;  %1303 = vlog2.f32 %v684_v53  ;;  %v666_v29 = vmul.f32 1.442695, %v605_v25 }
  0xe1   : > { %v1296_v10 = vpop.eup %1295  ;;  %v867_v11 = vpack.c.bf16 %v835_v5, %v835_v5  ;;  %v713_v61 = vmul.f32 0.6931472, %v1294_v7  ;;  %1305 = vlog2.f32 %v692_v48  ;;  %v582_v24 = vsub.f32 0.0, %v550_v0 }
  0xe2   : > { %923 = vst.msk [vmem:[%s1584_s6 + $0x68] sm:$0xf] %vm896_vm1, %v890_v34  ;;  %v795_v13 = vadd.f32 %v759_v8, %v539_v31  ;;  %v700_v14 = vadd.f32 1.0, %v1296_v10  ;;  %1307 = vpow2.f32 %v634_v47  ;;  %v1298_v17 = vpop.eup %1297  ;;  %v1687_v35 = vadd.f32 %v1508_v20, %v487_v16 }
  0xe3   : > { %900 = vst.msk [vmem:[%s1584_s6 + $0xc] sm:$0xf] %vm896_vm1, %v867_v11  ;;  %v772_v19 = vadd.f32 %v713_v61, %v516_v52  ;;  %1309 = vpow2.f32 %v650_v12  ;;  %v677_v26 = vadd.f32 1.0, %v1298_v17  ;;  %v590_v40 = vsub.f32 0.0, %v558_v30 }
  0xe4   : > { %v1300_v23 = vpop.eup %1299  ;;  %1311 = vtanh.f32 %v795_v13  ;;  %v1691_v41 = vadd.f32 %v1508_v20, %v507_v22  ;;  %v540_v53 = vmax.f32 %v1622_v9, 0.0  ;;  %v566_v59 = vand.u32 2147483647, %v1687_v35 }
  0xe5   : > { %v1302_v31 = vpop.eup %1301  ;;  %v843_v32 = vmul.f32 %v1300_v23, %v1566_v45  ;;  %1313 = vtanh.f32 %v772_v19  ;;  %v620_v45 = vmul.f32 1.442695, %v582_v24  ;;  %v636_v18 = vmul.f32 1.442695, %v590_v40 }
  0xe6   : > { %v1304_v39 = vpop.eup %1303  ;;  %v851_v38 = vmul.f32 %v1302_v31, %v1577_v15  ;;  %1315 = vlog2.f32 %v700_v14  ;;  %v517_v1 = vmax.f32 %v1639_v36, 0.0  ;;  %v574_v4 = vand.u32 2147483647, %v1691_v41 }
  0xe7   : > { %v1306_v42 = vpop.eup %1305  ;;  %v875_v43 = vpack.c.bf16 %v843_v32, %v843_v32  ;;  %v729_v46 = vmul.f32 0.6931472, %v1304_v39  ;;  %1317 = vlog2.f32 %v677_v26  ;;  %v598_v7 = vsub.f32 0.0, %v566_v59 }
  0xe8   : > { %v1308_v56 = vpop.eup %1307  ;;  %v883_v49 = vpack.c.bf16 %v851_v38, %v851_v38  ;;  %v745_v50 = vmul.f32 0.6931472, %v1306_v42  ;;  %1319 = vpow2.f32 %v666_v29  ;;  %v1704_v34 = vadd.f32 %v1508_v20, %v449_v54  ;;  %v509_v29 = vpop.f32.mrf.mxu3 }
  0xe9   : > { %v1310_v52 = vpop.eup %1309  ;;  %908 = vst.msk [vmem:[%s1584_s6 + $0x2c] sm:$0xf] %vm896_vm1, %v875_v43  ;;  %v780_v15 = vadd.f32 %v729_v46, %v524_v44  ;;  %v685_v47 = vadd.f32 1.0, %v1308_v56  ;;  %1321 = vpow2.f32 %v620_v45  ;;  %v652_v13 = vmul.f32 1.442695, %v598_v7  ;;  %v469_v44 = vpop.f32.mrf.mxu1 }
  0xea   : > { %v1312_v55 = vpop.eup %1311  ;;  %916 = vst.msk [vmem:[%s1584_s6 + $0x4c] sm:$0xf] %vm896_vm1, %v883_v49  ;;  %v788_v58 = vadd.f32 %v745_v50, %v532_v21  ;;  %v693_v48 = vadd.f32 1.0, %v1310_v52  ;;  %1323 = vpow2.f32 %v636_v18  ;;  %v525_v16 = vmax.f32 %v1643_v33, 0.0  ;;  %v489_v21 = vpop.f32.mrf.mxu2 }
  0xeb   : > { %v1314_v62 = vpop.eup %1313  ;;  %v859_v51 = vmul.f32 %v1312_v55, %v1588_v27  ;;  %1325 = vtanh.f32 %v780_v15  ;;  %v606_v27 = vsub.f32 0.0, %v574_v4  ;;  %v533_v17 = vmax.f32 %v1656_v37, 0.0 }
  0xec   : > { %v1316_v5 = vpop.eup %1315  ;;  %v836_v6 = vmul.f32 %v1314_v62, %v1599_v57  ;;  %1327 = vtanh.f32 %v788_v58  ;;  %v551_v26 = vand.u32 2147483647, %v1704_v34  ;;  %v1714_v24 = vadd.f32 %v1508_v20, %v469_v44 }
  0xed   : > { %v1318_v8 = vpop.eup %1317  ;;  %v891_v25 = vpack.c.bf16 %v859_v51, %v859_v51  ;;  %v761_v10 = vmul.f32 0.6931472, %v1316_v5  ;;  %1329 = vlog2.f32 %v685_v47  ;;  %v668_v32 = vmul.f32 1.442695, %v606_v27 }
  0xee   : > { %v1320_v11 = vpop.eup %1319  ;;  %v868_v61 = vpack.c.bf16 %v836_v6, %v836_v6  ;;  %v715_v12 = vmul.f32 0.6931472, %v1318_v8  ;;  %1331 = vlog2.f32 %v693_v48  ;;  %v583_v40 = vsub.f32 0.0, %v551_v26 }
  0xef   : > { %v1322_v14 = vpop.eup %1321  ;;  %924 = vst.msk [vmem:[%s1584_s6 + $0x6c] sm:$0xf] %vm896_vm1, %v891_v25  ;;  %v796_v57 = vadd.f32 %v761_v10, %v540_v53  ;;  %v701_v19 = vadd.f32 1.0, %v1320_v11  ;;  %1333 = vpow2.f32 %v652_v13  ;;  %v1718_v42 = vadd.f32 %v1508_v20, %v489_v21 }
  0xf0   : > { %v1324_v0 = vpop.eup %1323  ;;  %901 = vst.msk [vmem:[%s1584_s6 + $0x10] sm:$0xf] %vm896_vm1, %v868_v61  ;;  %v773_v22 = vadd.f32 %v715_v12, %v517_v1  ;;  %v678_v23 = vadd.f32 1.0, %v1322_v14  ;;  %v559_v45 = vand.u32 2147483647, %v1714_v24  ;;  %v1723_v56 = vadd.f32 %v1508_v20, %v509_v29 }
  0xf1   : > { %v1326_v30 = vpop.eup %1325  ;;  %1335 = vtanh.f32 %v796_v57  ;;  %v686_v31 = vadd.f32 1.0, %v1324_v0  ;;  %v567_v54 = vand.u32 2147483647, %v1718_v42  ;;  %v541_v51 = vmax.f32 %v1660_v63, 0.0 }
  0xf2   : > { %v1328_v39 = vpop.eup %1327  ;;  %v844_v38 = vmul.f32 %v1326_v30, %v1603_v3  ;;  %1337 = vtanh.f32 %v773_v22  ;;  %v622_v3 = vmul.f32 1.442695, %v583_v40  ;;  %v591_v53 = vsub.f32 0.0, %v559_v45 }
  0xf3   : > { %v1330_v43 = vpop.eup %1329  ;;  %v852_v46 = vmul.f32 %v1328_v39, %v1619_v28  ;;  %1339 = vlog2.f32 %v701_v19  ;;  %v599_v1 = vsub.f32 0.0, %v567_v54  ;;  %v518_v6 = vmax.f32 %v1671_v2, 0.0 }
  0xf4   : > { %v1332_v49 = vpop.eup %1331  ;;  %v876_v50 = vpack.c.bf16 %v844_v38, %v844_v38  ;;  %v731_v18 = vmul.f32 0.6931472, %v1330_v43  ;;  %1341 = vlog2.f32 %v678_v23  ;;  %v638_v48 = vmul.f32 1.442695, %v591_v53 }
  0xf5   : > { %v884_v52 = vpack.c.bf16 %v852_v46, %v852_v46  ;;  %v747_v15 = vmul.f32 0.6931472, %v1332_v49  ;;  %1343 = vlog2.f32 %v686_v31  ;;  %v1334_v47 = vpop.eup %1333  ;;  %v575_v7 = vand.u32 2147483647, %v1723_v56 }
  0xf6   : > { %909 = vst.msk [vmem:[%s1584_s6 + $0x30] sm:$0xf] %vm896_vm1, %v876_v50  ;;  %v781_v28 = vadd.f32 %v731_v18, %v525_v16  ;;  %1345 = vpow2.f32 %v668_v32  ;;  %v694_v58 = vadd.f32 1.0, %v1334_v47  ;;  %v654_v27 = vmul.f32 1.442695, %v599_v1 }
  0xf7   : > { %v1336_v55 = vpop.eup %1335  ;;  %917 = vst.msk [vmem:[%s1584_s6 + $0x50] sm:$0xf] %vm896_vm1, %v884_v52  ;;  %v789_v20 = vadd.f32 %v747_v15, %v533_v17  ;;  %1347 = vpow2.f32 %v622_v3  ;;  %v607_v12 = vsub.f32 0.0, %v575_v7  ;;  %v526_v44 = vmax.f32 %v1675_v60, 0.0 }
  0xf8   : > { %v1338_v59 = vpop.eup %1337  ;;  %v860_v62 = vmul.f32 %v1336_v55, %v1622_v9  ;;  %1349 = vtanh.f32 %v781_v28  ;;  %v534_v39 = vmax.f32 %v1687_v35, 0.0  ;;  %v542_v54 = vmax.f32 %v1691_v41, 0.0 }
  0xf9   : > { %v1340_v4 = vpop.eup %1339  ;;  %v837_v5 = vmul.f32 %v1338_v59, %v1639_v36  ;;  %1351 = vtanh.f32 %v789_v20  ;;  %v670_v26 = vmul.f32 1.442695, %v607_v12  ;;  %v527_v1 = vmax.f32 %v1714_v24, 0.0 }
  0xfa   : > { %v1342_v8 = vpop.eup %1341  ;;  %v892_v25 = vpack.c.bf16 %v860_v62, %v860_v62  ;;  %v763_v10 = vmul.f32 0.6931472, %v1340_v4  ;;  %1353 = vlog2.f32 %v694_v58  ;;  %v519_v58 = vmax.f32 %v1704_v34, 0.0 }
  0xfb   : > { %v1344_v9 = vpop.eup %1343  ;;  %v869_v11 = vpack.c.bf16 %v837_v5, %v837_v5  ;;  %v717_v61 = vmul.f32 0.6931472, %v1342_v8  ;;  %1355 = vpow2.f32 %v638_v48  ;;  %v535_v8 = vmax.f32 %v1718_v42, 0.0 }
  0xfc   : > { %v1346_v13 = vpop.eup %1345  ;;  %925 = vst.msk [vmem:[%s1584_s6 + $0x70] sm:$0xf] %vm896_vm1, %v892_v25  ;;  %v797_v36 = vadd.f32 %v763_v10, %v541_v51  ;;  %v733_v14 = vmul.f32 0.6931472, %v1344_v9  ;;  %1357 = vpow2.f32 %v654_v27 }
  0xfd   : > { %v1348_v57 = vpop.eup %1347  ;;  %902 = vst.msk [vmem:[%s1584_s6 + $0x14] sm:$0xf] %vm896_vm1, %v869_v11  ;;  %v774_v16 = vadd.f32 %v717_v61, %v518_v6  ;;  %v702_v17 = vadd.f32 1.0, %v1346_v13 }
  0xfe   : > { %v1350_v19 = vpop.eup %1349  ;;  %1359 = vtanh.f32 %v797_v36  ;;  %v782_v21 = vadd.f32 %v733_v14, %v526_v44  ;;  %v679_v0 = vadd.f32 1.0, %v1348_v57  ;;  %v543_v44 = vmax.f32 %v1723_v56, 0.0 }
  0xff   : > { %v1352_v22 = vpop.eup %1351  ;;  %v845_v23 = vmul.f32 %v1350_v19, %v1643_v33  ;;  %1361 = vtanh.f32 %v774_v16 }
 0x100   : > { %v1354_v29 = vpop.eup %1353  ;;  %v853_v30 = vmul.f32 %v1352_v22, %v1656_v37  ;;  %1363 = vtanh.f32 %v782_v21 }
 0x101   : > { %v1356_v31 = vpop.eup %1355  ;;  %v877_v32 = vpack.c.bf16 %v845_v23, %v845_v23  ;;  %v749_v38 = vmul.f32 0.6931472, %v1354_v29  ;;  %1365 = vlog2.f32 %v702_v17 }
 0x102   : > { %v1358_v40 = vpop.eup %1357  ;;  %v885_v43 = vpack.c.bf16 %v853_v30, %v853_v30  ;;  %1367 = vlog2.f32 %v679_v0  ;;  %v687_v46 = vadd.f32 1.0, %v1356_v31 }
 0x103   : > { %910 = vst.msk [vmem:[%s1584_s6 + $0x34] sm:$0xf] %vm896_vm1, %v877_v32  ;;  %v790_v33 = vadd.f32 %v749_v38, %v534_v39  ;;  %v695_v45 = vadd.f32 1.0, %v1358_v40  ;;  %1369 = vpow2.f32 %v670_v26 }
 0x104   : > { %v1360_v49 = vpop.eup %1359  ;;  %918 = vst.msk [vmem:[%s1584_s6 + $0x54] sm:$0xf] %vm896_vm1, %v885_v43  ;;  %1371 = vlog2.f32 %v687_v46 }
 0x105   : > { %v1362_v37 = vpop.eup %1361  ;;  %v861_v50 = vmul.f32 %v1360_v49, %v1660_v63  ;;  %1373 = vtanh.f32 %v790_v33 }
 0x106   : > { %v1364_v18 = vpop.eup %1363  ;;  %v838_v3 = vmul.f32 %v1362_v37, %v1671_v2  ;;  %1375 = vlog2.f32 %v695_v45 }
 0x107   : > { %v1366_v52 = vpop.eup %1365  ;;  %v893_v15 = vpack.c.bf16 %v861_v50, %v861_v50  ;;  %v846_v53 = vmul.f32 %v1364_v18, %v1675_v60 }
 0x108   : > { %v1368_v47 = vpop.eup %1367  ;;  %v870_v28 = vpack.c.bf16 %v838_v3, %v838_v3  ;;  %v765_v55 = vmul.f32 0.6931472, %v1366_v52 }
 0x109   : > { %v1370_v20 = vpop.eup %1369  ;;  %926 = vst.msk [vmem:[%s1584_s6 + $0x74] sm:$0xf] %vm896_vm1, %v893_v15  ;;  %v878_v63 = vpack.c.bf16 %v846_v53, %v846_v53  ;;  %v719_v48 = vmul.f32 0.6931472, %v1368_v47 }
 0x10a   : > { %v1372_v59 = vpop.eup %1371  ;;  %903 = vst.msk [vmem:[%s1584_s6 + $0x18] sm:$0xf] %vm896_vm1, %v870_v28  ;;  %v798_v2 = vadd.f32 %v765_v55, %v542_v54  ;;  %v703_v62 = vadd.f32 1.0, %v1370_v20 }
 0x10b   : > { %v1374_v51 = vpop.eup %1373  ;;  %911 = vst.msk [vmem:[%s1584_s6 + $0x38] sm:$0xf] %vm896_vm1, %v878_v63  ;;  %v775_v60 = vadd.f32 %v719_v48, %v519_v58  ;;  %v735_v4 = vmul.f32 0.6931472, %v1372_v59 }
 0x10c   : > { %v1376_v5 = vpop.eup %1375  ;;  %v854_v6 = vmul.f32 %v1374_v51, %v1687_v35  ;;  %1377 = vtanh.f32 %v798_v2 }
 0x10d   : > { %1379 = vtanh.f32 %v775_v60  ;;  %v783_v7 = vadd.f32 %v735_v4, %v527_v1  ;;  %v751_v25 = vmul.f32 0.6931472, %v1376_v5 }
 0x10e   : > { %v886_v10 = vpack.c.bf16 %v854_v6, %v854_v6  ;;  %1381 = vlog2.f32 %v703_v62 }
 0x10f   : > { %1383 = vtanh.f32 %v783_v7  ;;  %v791_v27 = vadd.f32 %v751_v25, %v535_v8 }
 0x110   : > { %919 = vst.msk [vmem:[%s1584_s6 + $0x58] sm:$0xf] %vm896_vm1, %v886_v10 }
 0x111   : > { %1385 = vtanh.f32 %v791_v27 }
 0x112   : > { %v1378_v9 = vpop.eup %1377 }
 0x113   : > { %v1380_v11 = vpop.eup %1379  ;;  %v862_v61 = vmul.f32 %v1378_v9, %v1691_v41 }
 0x114   : > { %v1382_v35 = vpop.eup %1381  ;;  %v839_v12 = vmul.f32 %v1380_v11, %v1704_v34 }
 0x115   : > { %v1384_v13 = vpop.eup %1383  ;;  %v894_v36 = vpack.c.bf16 %v862_v61, %v862_v61  ;;  %v767_v14 = vmul.f32 0.6931472, %v1382_v35 }
 0x116   : > { %v871_v57 = vpack.c.bf16 %v839_v12, %v839_v12  ;;  %v847_v16 = vmul.f32 %v1384_v13, %v1714_v24 }
 0x117   : > { %v1386_v17 = vpop.eup %1385  ;;  %927 = vst.msk [vmem:[%s1584_s6 + $0x78] sm:$0xf] %vm896_vm1, %v894_v36  ;;  %v799_v19 = vadd.f32 %v767_v14, %v543_v44 }
 0x118   : > { %904 = vst.msk [vmem:[%s1584_s6 + $0x1c] sm:$0xf] %vm896_vm1, %v871_v57  ;;  %v879_v41 = vpack.c.bf16 %v847_v16, %v847_v16  ;;  %v855_v21 = vmul.f32 %v1386_v17, %v1718_v42 }
 0x119   : > { %1387 = vtanh.f32 %v799_v19 }
 0x11a   : > { %912 = vst.msk [vmem:[%s1584_s6 + $0x3c] sm:$0xf] %vm896_vm1, %v879_v41  ;;  %v887_v34 = vpack.c.bf16 %v855_v21, %v855_v21 }
 0x11c   : > { %920 = vst.msk [vmem:[%s1584_s6 + $0x5c] sm:$0xf] %vm896_vm1, %v887_v34 }
 0x11f   : > { %v1388_v0 = vpop.eup %1387 }
 0x120   : > { %v863_v22 = vmul.f32 %v1388_v0, %v1723_v56 }
 0x122   : > { %v895_v23 = vpack.c.bf16 %v863_v22, %v863_v22 }
 0x124   : > { %928 = vst.msk [vmem:[%s1584_s6 + $0x7c] sm:$0xf] %vm896_vm1, %v895_v23 }
 0x125 PF: > { %s13_s14 = sadd.s32 1, %s1411_s14   ;;  %s1792_s12 = smov %s1407_s13 }
 0x126   : > { %p10_p5 = scmp.ge.s32.totalorder %s13_s14, 4   ;;  %s1793_s13 = smov %s1795_s15 }
 0x128   :  { %12 = sbr.rel (!%p10_p5) target bundleno = 2 (0x2), region = 68 }

</bundles_post_ra>
